<compile_context>
chip_gen: v7x
topology: tpu7x:2x2x1
jax: 0.10.0
libtpu: 0.0.40
codegen_flags: <defaults>
</compile_context>

<pallas_src>
import functools

import jax
import jax.numpy as jnp
from jax.experimental import pallas as pl
from jax.experimental.pallas import tpu as pltpu

BN_EPS = 1e-5


# ----------------------------------------------------------------------------
# Fused Pallas kernel: embedding gather, every conv+BN+ReLU stack, max-pools,
# feature concat and final Linear — all in one kernel body.
# ----------------------------------------------------------------------------
def _fused_forward_kernel(tok_ref, embed_ref, wc_ref, bc_ref, wl_ref, bl_ref,
                          o_ref, *, block_num, seq_len, seq_pad):
    # tok_ref : (bb*Lp, 1) int32   flattened token ids for this batch tile
    # embed_ref: (V, E)    f32     embedding table (row 0 == padding_idx)
    # wc_ref  : (n_layers, 3E, E)  BN-folded, tap-fused conv weights
    # bc_ref  : (n_layers, 1, E)   BN-folded conv biases (f32)
    # wl_ref  : (block_num*E, E)   final Linear weight (pre-transposed)
    # bl_ref  : (1, E)             final Linear bias (f32)
    # o_ref   : (bb, E)            output tile
    N = tok_ref.shape[0]              # bb * Lp
    V, E = embed_ref.shape
    bb = N // seq_pad
    cdtype = wc_ref.dtype             # MXU operand dtype (f32 here; bf16 on v6e/v7x)

    # ---- (1) In-kernel embedding gather as an exact one-hot MXU matmul ------
    tok = tok_ref[...]                                                   # (N, 1)
    onehot = (jax.lax.broadcasted_iota(jnp.int32, (N, V), 1) == tok).astype(cdtype)
    x = jnp.dot(onehot, embed_ref[...].astype(cdtype),
                preferred_element_type=jnp.float32)                      # (N, E) f32

    zero1 = jnp.zeros((1, E), jnp.float32)
    zero2 = jnp.zeros((2, E), jnp.float32)

    feats = []
    layer_idx = 0
    for blk in range(block_num):                     # StackCNN(blk + 1, E, E, 3)
        h = x
        for _ in range(blk + 1):                     # Conv1d(k=3, VALID) + BN + ReLU
            # Batched, tap-fused conv: LHS row r = [h[r], h[r+1], h[r+2]].
            # Tail rows are garbage but never reach a valid row or the pool.
            t1 = jnp.concatenate([h[1:], zero1], axis=0)
            t2 = jnp.concatenate([h[2:], zero2], axis=0)
            lhs = jnp.concatenate([h, t1, t2], axis=-1).astype(cdtype)   # (N, 3E)
            acc = jnp.dot(lhs, wc_ref[layer_idx],
                          preferred_element_type=jnp.float32)            # (N, E)
            h = jnp.maximum(acc + bc_ref[layer_idx], 0.0)
            layer_idx += 1
        # AdaptiveMaxPool1d(1): per-sample max over the valid conv outputs only.
        valid = seq_len - 2 * (blk + 1)              # static python int
        pooled = jnp.concatenate(
            [jnp.max(h[s * seq_pad:s * seq_pad + valid], axis=0, keepdims=True)
             for s in range(bb)], axis=0)            # (bb, E)
        feats.append(pooled)

    # ---- (2) concat + Linear as ONE matmul, single dense output store -------
    feats = jnp.concatenate(feats, axis=-1).astype(cdtype)    # (bb, block_num*E)
    out = jnp.dot(feats, wl_ref[...],
                  preferred_element_type=jnp.float32) + bl_ref[...]
    o_ref[...] = out.astype(o_ref.dtype)


def fused_forward(tokens, embed, wc, bc, wl, bl, *, block_num):
    """tokens: (B, L) int32 -> (B, E) f32, whole forward in one pallas_call."""
    B, L = tokens.shape
    V, E = embed.shape
    n_layers = wc.shape[0]
    assert L > 2 * block_num, "sequence too short for the deepest StackCNN"

    # Pad the sequence to a sublane multiple (pad token = padding_idx 0); the
    # pad rows are excluded from the pooled range so results are unchanged.
    Lp = ((L + 7) // 8) * 8
    if Lp != L:
        tokens = jnp.pad(tokens, ((0, 0), (0, Lp - L)))
    tok_flat = tokens.reshape(B * Lp, 1).astype(jnp.int32)

    # Batch tile: whole batch when small, else a multiple of 8 dividing B so a
    # parallel grid can spread tiles across TensorCores (v7x) and keep the
    # per-step working set VMEM-safe (v7x has 64 MiB).
    bb = B
    for cand in (64, 32, 16, 8):
        if B > cand and B % cand == 0:
            bb = cand
            break
    grid = (B // bb,)

    kernel = functools.partial(_fused_forward_kernel, block_num=block_num,
                               seq_len=L, seq_pad=Lp)
    return pl.pallas_call(
        kernel,
        out_shape=jax.ShapeDtypeStruct((B, E), jnp.float32),
        grid=grid,
        in_specs=[
            pl.BlockSpec((bb * Lp, 1), lambda i: (i, 0)),            # tokens (tiled)
            pl.BlockSpec((V, E), lambda i: (0, 0)),                  # embed table
            pl.BlockSpec((n_layers, 3 * E, E), lambda i: (0, 0, 0)),  # conv weights
            pl.BlockSpec((n_layers, 1, E), lambda i: (0, 0, 0)),      # conv biases
            pl.BlockSpec((block_num * E, E), lambda i: (0, 0)),       # linear weight
            pl.BlockSpec((1, E), lambda i: (0, 0)),                   # linear bias
        ],
        out_specs=pl.BlockSpec((bb, E), lambda i: (i, 0)),
        compiler_params=pltpu.CompilerParams(
            dimension_semantics=("parallel",),
            vmem_limit_bytes=48 * 1024 * 1024,
        ),
    )(tok_flat, embed, wc, bc, wl, bl)


# ----------------------------------------------------------------------------
# Parameter init (deterministic, mirrors the PyTorch module's shapes)
# ----------------------------------------------------------------------------
def init_params(key, block_num, vocab_size, embedding_num):
    E = embedding_num
    n_layers = block_num * (block_num + 1) // 2
    keys = iter(jax.random.split(key, 3 + 2 * n_layers))

    embed = 0.1 * jax.random.normal(next(keys), (vocab_size, E), jnp.float32)
    embed = embed.at[0].set(0.0)  # padding_idx=0

    blocks = []
    for block_idx in range(block_num):
        layers = []
        for _ in range(block_idx + 1):  # StackCNN(block_idx + 1, ...)
            layers.append(dict(
                w=0.1 * jax.random.normal(next(keys), (E, E, 3), jnp.float32),  # (O, C, K)
                b=0.01 * jax.random.normal(next(keys), (E,), jnp.float32),
                gamma=jnp.ones((E,), jnp.float32),
                beta=jnp.zeros((E,), jnp.float32),
                mean=jnp.zeros((E,), jnp.float32),
                var=jnp.ones((E,), jnp.float32),
            ))
        blocks.append(layers)

    lin_w = 0.1 * jax.random.normal(next(keys), (E, block_num * E), jnp.float32)
    lin_b = 0.01 * jax.random.normal(next(keys), (E,), jnp.float32)
    return dict(embed=embed, blocks=blocks, lin_w=lin_w, lin_b=lin_b)


def prepare_params(params, *, mxu_dtype=jnp.float32):
    """Hoisted param prep (done once): fold eval-mode BN into each conv, fuse
    the 3 taps into a (3E, E) matrix per layer, pre-transpose the Linear.
    Set mxu_dtype=jnp.bfloat16 on v6e/v7x (loosen verification tolerances)."""
    E = params["lin_b"].shape[0]
    wc, bc = [], []
    for layers in params["blocks"]:
        for layer in layers:
            scale = layer["gamma"] / jnp.sqrt(layer["var"] + BN_EPS)          # (E,)
            # (O, C, K) -> (K, C, O), scaled on the out axis, taps stacked on K.
            w_eff = jnp.transpose(layer["w"], (2, 1, 0)) * scale[None, None, :]
            b_eff = (layer["b"] - layer["mean"]) * scale + layer["beta"]
            wc.append(w_eff.reshape(3 * E, E))                                # (3E, E)
            bc.append(b_eff.reshape(1, E))
    return dict(
        embed=params["embed"],                                   # (V, E) f32
        wc=jnp.stack(wc, axis=0).astype(mxu_dtype),              # (n_layers, 3E, E)
        bc=jnp.stack(bc, axis=0),                                # (n_layers, 1, E) f32
        wl=jnp.transpose(params["lin_w"]).astype(mxu_dtype),     # (block_num*E, E)
        bl=params["lin_b"].reshape(1, E),                        # (1, E) f32
    )


# ----------------------------------------------------------------------------
# Forward pass
# ----------------------------------------------------------------------------
@functools.partial(jax.jit, static_argnames=("block_num",))
def target_representation(tokens, prep, *, block_num):
    return fused_forward(tokens, prep["embed"], prep["wc"], prep["bc"],
                         prep["wl"], prep["bl"], block_num=block_num)


# Pure-JAX reference (NCL, mirrors the PyTorch module) for verification.
def reference_forward(tokens, params):
    x = jnp.take(params["embed"], tokens, axis=0).transpose(0, 2, 1)  # (B, E, L)
    feats = []
    for layers in params["blocks"]:
        h = x
        for layer in layers:
            y = jax.lax.conv_general_dilated(
                h, layer["w"], window_strides=(1,), padding="VALID",
                dimension_numbers=("NCH", "OIH", "NCH"))
            y = y + layer["b"][None, :, None]
            scale = layer["gamma"] / jnp.sqrt(layer["var"] + BN_EPS)
            y = (y - layer["mean"][None, :, None]) * scale[None, :, None] \
                + layer["beta"][None, :, None]
            h = jnp.maximum(y, 0.0)
        feats.append(jnp.max(h, axis=-1))
    cat = jnp.concatenate(feats, axis=-1)
    return cat @ params["lin_w"].T + params["lin_b"]


if __name__ == "__main__":
    block_num, vocab_size, embedding_num = 3, 25, 32
    batch, seq_len = 2, 16

    key = jax.random.PRNGKey(0)
    params = init_params(key, block_num, vocab_size, embedding_num)
    prep = prepare_params(params)   # keep f32 MXU operands for the strict check
    tokens = jax.random.randint(
        jax.random.fold_in(key, 999), (batch, seq_len), 0, vocab_size, dtype=jnp.int32)

    out = target_representation(tokens, prep, block_num=block_num)
    out = jax.block_until_ready(out)
    assert out.shape == (batch, embedding_num) and out.dtype == jnp.float32

    ref = jax.block_until_ready(reference_forward(tokens, params))
    assert jnp.allclose(out, ref, rtol=1e-4, atol=1e-4), \
        f"max err {jnp.max(jnp.abs(out - ref))}"

    print("KERNEL_OK")
</pallas_src>

<mosaic_0001>
module attributes {stable_mosaic.version = 11 : i64} {
  func.func @_fused_forward_kernel(%arg0: i32, %arg1: memref<32x1xi32, #tpu.memory_space<vmem>>, %arg2: memref<25x32xf32, #tpu.memory_space<vmem>>, %arg3: memref<6x96x32xf32, #tpu.memory_space<vmem>>, %arg4: memref<6x1x32xf32, #tpu.memory_space<vmem>>, %arg5: memref<96x32xf32, #tpu.memory_space<vmem>>, %arg6: memref<1x32xf32, #tpu.memory_space<vmem>>, %arg7: memref<2x32xf32, #tpu.memory_space<vmem>>) attributes {dimension_semantics = [#tpu.dimension_semantics<parallel>], iteration_bounds = array<i64: 1>, scalar_prefetch = 0 : i64, scratch_operands = 0 : i64, tpu.core_type = #tpu.core_type<tc>, window_params = [{transform_indices = @transform_0, window_bounds = array<i64: 32, 1>}, {pipeline_mode = #tpu.pipeline_mode<synchronous>, transform_indices = @transform_1, window_bounds = array<i64: 25, 32>}, {pipeline_mode = #tpu.pipeline_mode<synchronous>, transform_indices = @transform_2, window_bounds = array<i64: 6, 96, 32>}, {pipeline_mode = #tpu.pipeline_mode<synchronous>, transform_indices = @transform_3, window_bounds = array<i64: 6, 1, 32>}, {pipeline_mode = #tpu.pipeline_mode<synchronous>, transform_indices = @transform_4, window_bounds = array<i64: 96, 32>}, {pipeline_mode = #tpu.pipeline_mode<synchronous>, transform_indices = @transform_5, window_bounds = array<i64: 1, 32>}, {transform_indices = @transform_6, window_bounds = array<i64: 2, 32>}]} {
    %c0 = arith.constant 0 : index
    %c0_0 = arith.constant 0 : index
    %0 = vector.load %arg1[%c0, %c0_0] : memref<32x1xi32, #tpu.memory_space<vmem>>, vector<32x1xi32>
    %1 = tpu.iota {dimensions = array<i32: 1>} : vector<32x25xi32>
    %2 = vector.broadcast %0 : vector<32x1xi32> to vector<32x25xi32>
    %3 = arith.cmpi eq, %1, %2 : vector<32x25xi32>
    %4 = arith.extui %3 : vector<32x25xi1> to vector<32x25xi32>
    %5 = arith.sitofp %4 : vector<32x25xi32> to vector<32x25xf32>
    %c0_1 = arith.constant 0 : index
    %c0_2 = arith.constant 0 : index
    %6 = vector.load %arg2[%c0_1, %c0_2] : memref<25x32xf32, #tpu.memory_space<vmem>>, vector<25x32xf32>
    %cst = arith.constant dense<0.000000e+00> : vector<32x32xf32>
    %7 = tpu.matmul %5, %6, %cst {dimension_numbers = #tpu.dot_dimension_numbers<[1], [0], [0], [1], [0, 0, 1, 1], [], []>} : vector<32x25xf32>, vector<25x32xf32>, vector<32x32xf32> -> vector<32x32xf32>
    %cst_3 = arith.constant 0.000000e+00 : f32
    %8 = vector.broadcast %cst_3 : f32 to vector<1x32xf32>
    %cst_4 = arith.constant 0.000000e+00 : f32
    %9 = vector.broadcast %cst_4 : f32 to vector<2x32xf32>
    %10 = vector.extract_strided_slice %7 {offsets = [1, 0], sizes = [31, 32], strides = [1, 1]} : vector<32x32xf32> to vector<31x32xf32>
    %11 = tpu.concatenate %10, %8 in 0 : vector<31x32xf32>, vector<1x32xf32> -> vector<32x32xf32>
    %12 = vector.extract_strided_slice %7 {offsets = [2, 0], sizes = [30, 32], strides = [1, 1]} : vector<32x32xf32> to vector<30x32xf32>
    %13 = tpu.concatenate %12, %9 in 0 : vector<30x32xf32>, vector<2x32xf32> -> vector<32x32xf32>
    %14 = tpu.concatenate %7, %11, %13 in 1 : vector<32x32xf32>, vector<32x32xf32>, vector<32x32xf32> -> vector<32x96xf32>
    %c0_5 = arith.constant 0 : index
    %c0_6 = arith.constant 0 : index
    %c0_7 = arith.constant 0 : index
    %15 = vector.load %arg3[%c0_5, %c0_6, %c0_7] : memref<6x96x32xf32, #tpu.memory_space<vmem>>, vector<1x96x32xf32>
    %16 = vector.shape_cast %15 : vector<1x96x32xf32> to vector<96x32xf32>
    %cst_8 = arith.constant dense<0.000000e+00> : vector<32x32xf32>
    %17 = tpu.matmul %14, %16, %cst_8 {dimension_numbers = #tpu.dot_dimension_numbers<[1], [0], [0], [1], [0, 0, 1, 1], [], []>} : vector<32x96xf32>, vector<96x32xf32>, vector<32x32xf32> -> vector<32x32xf32>
    %c0_9 = arith.constant 0 : index
    %c0_10 = arith.constant 0 : index
    %c0_11 = arith.constant 0 : index
    %18 = vector.load %arg4[%c0_9, %c0_10, %c0_11] : memref<6x1x32xf32, #tpu.memory_space<vmem>>, vector<1x1x32xf32>
    %19 = vector.shape_cast %18 : vector<1x1x32xf32> to vector<1x32xf32>
    %20 = vector.broadcast %19 : vector<1x32xf32> to vector<32x32xf32>
    %21 = arith.addf %17, %20 : vector<32x32xf32>
    %cst_12 = arith.constant 0.000000e+00 : f32
    %22 = vector.broadcast %cst_12 : f32 to vector<32x32xf32>
    %23 = arith.maximumf %21, %22 : vector<32x32xf32>
    %24 = vector.extract_strided_slice %23 {offsets = [0, 0], sizes = [14, 32], strides = [1, 1]} : vector<32x32xf32> to vector<14x32xf32>
    %cst_13 = arith.constant dense<0xFF800000> : vector<32xf32>
    %25 = vector.multi_reduction <maximumf>, %24, %cst_13 [0] : vector<14x32xf32> to vector<32xf32>
    %26 = vector.shape_cast %25 : vector<32xf32> to vector<1x32xf32>
    %27 = vector.extract_strided_slice %23 {offsets = [16, 0], sizes = [14, 32], strides = [1, 1]} : vector<32x32xf32> to vector<14x32xf32>
    %cst_14 = arith.constant dense<0xFF800000> : vector<32xf32>
    %28 = vector.multi_reduction <maximumf>, %27, %cst_14 [0] : vector<14x32xf32> to vector<32xf32>
    %29 = vector.shape_cast %28 : vector<32xf32> to vector<1x32xf32>
    %30 = tpu.concatenate %26, %29 in 0 : vector<1x32xf32>, vector<1x32xf32> -> vector<2x32xf32>
    %31 = vector.extract_strided_slice %7 {offsets = [1, 0], sizes = [31, 32], strides = [1, 1]} : vector<32x32xf32> to vector<31x32xf32>
    %32 = tpu.concatenate %31, %8 in 0 : vector<31x32xf32>, vector<1x32xf32> -> vector<32x32xf32>
    %33 = vector.extract_strided_slice %7 {offsets = [2, 0], sizes = [30, 32], strides = [1, 1]} : vector<32x32xf32> to vector<30x32xf32>
    %34 = tpu.concatenate %33, %9 in 0 : vector<30x32xf32>, vector<2x32xf32> -> vector<32x32xf32>
    %35 = tpu.concatenate %7, %32, %34 in 1 : vector<32x32xf32>, vector<32x32xf32>, vector<32x32xf32> -> vector<32x96xf32>
    %c1 = arith.constant 1 : index
    %c0_15 = arith.constant 0 : index
    %c0_16 = arith.constant 0 : index
    %36 = vector.load %arg3[%c1, %c0_15, %c0_16] : memref<6x96x32xf32, #tpu.memory_space<vmem>>, vector<1x96x32xf32>
    %37 = vector.shape_cast %36 : vector<1x96x32xf32> to vector<96x32xf32>
    %cst_17 = arith.constant dense<0.000000e+00> : vector<32x32xf32>
    %38 = tpu.matmul %35, %37, %cst_17 {dimension_numbers = #tpu.dot_dimension_numbers<[1], [0], [0], [1], [0, 0, 1, 1], [], []>} : vector<32x96xf32>, vector<96x32xf32>, vector<32x32xf32> -> vector<32x32xf32>
    %c1_18 = arith.constant 1 : index
    %c0_19 = arith.constant 0 : index
    %c0_20 = arith.constant 0 : index
    %39 = vector.load %arg4[%c1_18, %c0_19, %c0_20] : memref<6x1x32xf32, #tpu.memory_space<vmem>>, vector<1x1x32xf32>
    %40 = vector.shape_cast %39 : vector<1x1x32xf32> to vector<1x32xf32>
    %41 = vector.broadcast %40 : vector<1x32xf32> to vector<32x32xf32>
    %42 = arith.addf %38, %41 : vector<32x32xf32>
    %cst_21 = arith.constant 0.000000e+00 : f32
    %43 = vector.broadcast %cst_21 : f32 to vector<32x32xf32>
    %44 = arith.maximumf %42, %43 : vector<32x32xf32>
    %45 = vector.extract_strided_slice %44 {offsets = [1, 0], sizes = [31, 32], strides = [1, 1]} : vector<32x32xf32> to vector<31x32xf32>
    %46 = tpu.concatenate %45, %8 in 0 : vector<31x32xf32>, vector<1x32xf32> -> vector<32x32xf32>
    %47 = vector.extract_strided_slice %44 {offsets = [2, 0], sizes = [30, 32], strides = [1, 1]} : vector<32x32xf32> to vector<30x32xf32>
    %48 = tpu.concatenate %47, %9 in 0 : vector<30x32xf32>, vector<2x32xf32> -> vector<32x32xf32>
    %49 = tpu.concatenate %44, %46, %48 in 1 : vector<32x32xf32>, vector<32x32xf32>, vector<32x32xf32> -> vector<32x96xf32>
    %c2 = arith.constant 2 : index
    %c0_22 = arith.constant 0 : index
    %c0_23 = arith.constant 0 : index
    %50 = vector.load %arg3[%c2, %c0_22, %c0_23] : memref<6x96x32xf32, #tpu.memory_space<vmem>>, vector<1x96x32xf32>
    %51 = vector.shape_cast %50 : vector<1x96x32xf32> to vector<96x32xf32>
    %cst_24 = arith.constant dense<0.000000e+00> : vector<32x32xf32>
    %52 = tpu.matmul %49, %51, %cst_24 {dimension_numbers = #tpu.dot_dimension_numbers<[1], [0], [0], [1], [0, 0, 1, 1], [], []>} : vector<32x96xf32>, vector<96x32xf32>, vector<32x32xf32> -> vector<32x32xf32>
    %c2_25 = arith.constant 2 : index
    %c0_26 = arith.constant 0 : index
    %c0_27 = arith.constant 0 : index
    %53 = vector.load %arg4[%c2_25, %c0_26, %c0_27] : memref<6x1x32xf32, #tpu.memory_space<vmem>>, vector<1x1x32xf32>
    %54 = vector.shape_cast %53 : vector<1x1x32xf32> to vector<1x32xf32>
    %55 = vector.broadcast %54 : vector<1x32xf32> to vector<32x32xf32>
    %56 = arith.addf %52, %55 : vector<32x32xf32>
    %cst_28 = arith.constant 0.000000e+00 : f32
    %57 = vector.broadcast %cst_28 : f32 to vector<32x32xf32>
    %58 = arith.maximumf %56, %57 : vector<32x32xf32>
    %59 = vector.extract_strided_slice %58 {offsets = [0, 0], sizes = [12, 32], strides = [1, 1]} : vector<32x32xf32> to vector<12x32xf32>
    %cst_29 = arith.constant dense<0xFF800000> : vector<32xf32>
    %60 = vector.multi_reduction <maximumf>, %59, %cst_29 [0] : vector<12x32xf32> to vector<32xf32>
    %61 = vector.shape_cast %60 : vector<32xf32> to vector<1x32xf32>
    %62 = vector.extract_strided_slice %58 {offsets = [16, 0], sizes = [12, 32], strides = [1, 1]} : vector<32x32xf32> to vector<12x32xf32>
    %cst_30 = arith.constant dense<0xFF800000> : vector<32xf32>
    %63 = vector.multi_reduction <maximumf>, %62, %cst_30 [0] : vector<12x32xf32> to vector<32xf32>
    %64 = vector.shape_cast %63 : vector<32xf32> to vector<1x32xf32>
    %65 = tpu.concatenate %61, %64 in 0 : vector<1x32xf32>, vector<1x32xf32> -> vector<2x32xf32>
    %66 = vector.extract_strided_slice %7 {offsets = [1, 0], sizes = [31, 32], strides = [1, 1]} : vector<32x32xf32> to vector<31x32xf32>
    %67 = tpu.concatenate %66, %8 in 0 : vector<31x32xf32>, vector<1x32xf32> -> vector<32x32xf32>
    %68 = vector.extract_strided_slice %7 {offsets = [2, 0], sizes = [30, 32], strides = [1, 1]} : vector<32x32xf32> to vector<30x32xf32>
    %69 = tpu.concatenate %68, %9 in 0 : vector<30x32xf32>, vector<2x32xf32> -> vector<32x32xf32>
    %70 = tpu.concatenate %7, %67, %69 in 1 : vector<32x32xf32>, vector<32x32xf32>, vector<32x32xf32> -> vector<32x96xf32>
    %c3 = arith.constant 3 : index
    %c0_31 = arith.constant 0 : index
    %c0_32 = arith.constant 0 : index
    %71 = vector.load %arg3[%c3, %c0_31, %c0_32] : memref<6x96x32xf32, #tpu.memory_space<vmem>>, vector<1x96x32xf32>
    %72 = vector.shape_cast %71 : vector<1x96x32xf32> to vector<96x32xf32>
    %cst_33 = arith.constant dense<0.000000e+00> : vector<32x32xf32>
    %73 = tpu.matmul %70, %72, %cst_33 {dimension_numbers = #tpu.dot_dimension_numbers<[1], [0], [0], [1], [0, 0, 1, 1], [], []>} : vector<32x96xf32>, vector<96x32xf32>, vector<32x32xf32> -> vector<32x32xf32>
    %c3_34 = arith.constant 3 : index
    %c0_35 = arith.constant 0 : index
    %c0_36 = arith.constant 0 : index
    %74 = vector.load %arg4[%c3_34, %c0_35, %c0_36] : memref<6x1x32xf32, #tpu.memory_space<vmem>>, vector<1x1x32xf32>
    %75 = vector.shape_cast %74 : vector<1x1x32xf32> to vector<1x32xf32>
    %76 = vector.broadcast %75 : vector<1x32xf32> to vector<32x32xf32>
    %77 = arith.addf %73, %76 : vector<32x32xf32>
    %cst_37 = arith.constant 0.000000e+00 : f32
    %78 = vector.broadcast %cst_37 : f32 to vector<32x32xf32>
    %79 = arith.maximumf %77, %78 : vector<32x32xf32>
    %80 = vector.extract_strided_slice %79 {offsets = [1, 0], sizes = [31, 32], strides = [1, 1]} : vector<32x32xf32> to vector<31x32xf32>
    %81 = tpu.concatenate %80, %8 in 0 : vector<31x32xf32>, vector<1x32xf32> -> vector<32x32xf32>
    %82 = vector.extract_strided_slice %79 {offsets = [2, 0], sizes = [30, 32], strides = [1, 1]} : vector<32x32xf32> to vector<30x32xf32>
    %83 = tpu.concatenate %82, %9 in 0 : vector<30x32xf32>, vector<2x32xf32> -> vector<32x32xf32>
    %84 = tpu.concatenate %79, %81, %83 in 1 : vector<32x32xf32>, vector<32x32xf32>, vector<32x32xf32> -> vector<32x96xf32>
    %c4 = arith.constant 4 : index
    %c0_38 = arith.constant 0 : index
    %c0_39 = arith.constant 0 : index
    %85 = vector.load %arg3[%c4, %c0_38, %c0_39] : memref<6x96x32xf32, #tpu.memory_space<vmem>>, vector<1x96x32xf32>
    %86 = vector.shape_cast %85 : vector<1x96x32xf32> to vector<96x32xf32>
    %cst_40 = arith.constant dense<0.000000e+00> : vector<32x32xf32>
    %87 = tpu.matmul %84, %86, %cst_40 {dimension_numbers = #tpu.dot_dimension_numbers<[1], [0], [0], [1], [0, 0, 1, 1], [], []>} : vector<32x96xf32>, vector<96x32xf32>, vector<32x32xf32> -> vector<32x32xf32>
    %c4_41 = arith.constant 4 : index
    %c0_42 = arith.constant 0 : index
    %c0_43 = arith.constant 0 : index
    %88 = vector.load %arg4[%c4_41, %c0_42, %c0_43] : memref<6x1x32xf32, #tpu.memory_space<vmem>>, vector<1x1x32xf32>
    %89 = vector.shape_cast %88 : vector<1x1x32xf32> to vector<1x32xf32>
    %90 = vector.broadcast %89 : vector<1x32xf32> to vector<32x32xf32>
    %91 = arith.addf %87, %90 : vector<32x32xf32>
    %cst_44 = arith.constant 0.000000e+00 : f32
    %92 = vector.broadcast %cst_44 : f32 to vector<32x32xf32>
    %93 = arith.maximumf %91, %92 : vector<32x32xf32>
    %94 = vector.extract_strided_slice %93 {offsets = [1, 0], sizes = [31, 32], strides = [1, 1]} : vector<32x32xf32> to vector<31x32xf32>
    %95 = tpu.concatenate %94, %8 in 0 : vector<31x32xf32>, vector<1x32xf32> -> vector<32x32xf32>
    %96 = vector.extract_strided_slice %93 {offsets = [2, 0], sizes = [30, 32], strides = [1, 1]} : vector<32x32xf32> to vector<30x32xf32>
    %97 = tpu.concatenate %96, %9 in 0 : vector<30x32xf32>, vector<2x32xf32> -> vector<32x32xf32>
    %98 = tpu.concatenate %93, %95, %97 in 1 : vector<32x32xf32>, vector<32x32xf32>, vector<32x32xf32> -> vector<32x96xf32>
    %c5 = arith.constant 5 : index
    %c0_45 = arith.constant 0 : index
    %c0_46 = arith.constant 0 : index
    %99 = vector.load %arg3[%c5, %c0_45, %c0_46] : memref<6x96x32xf32, #tpu.memory_space<vmem>>, vector<1x96x32xf32>
    %100 = vector.shape_cast %99 : vector<1x96x32xf32> to vector<96x32xf32>
    %cst_47 = arith.constant dense<0.000000e+00> : vector<32x32xf32>
    %101 = tpu.matmul %98, %100, %cst_47 {dimension_numbers = #tpu.dot_dimension_numbers<[1], [0], [0], [1], [0, 0, 1, 1], [], []>} : vector<32x96xf32>, vector<96x32xf32>, vector<32x32xf32> -> vector<32x32xf32>
    %c5_48 = arith.constant 5 : index
    %c0_49 = arith.constant 0 : index
    %c0_50 = arith.constant 0 : index
    %102 = vector.load %arg4[%c5_48, %c0_49, %c0_50] : memref<6x1x32xf32, #tpu.memory_space<vmem>>, vector<1x1x32xf32>
    %103 = vector.shape_cast %102 : vector<1x1x32xf32> to vector<1x32xf32>
    %104 = vector.broadcast %103 : vector<1x32xf32> to vector<32x32xf32>
    %105 = arith.addf %101, %104 : vector<32x32xf32>
    %cst_51 = arith.constant 0.000000e+00 : f32
    %106 = vector.broadcast %cst_51 : f32 to vector<32x32xf32>
    %107 = arith.maximumf %105, %106 : vector<32x32xf32>
    %108 = vector.extract_strided_slice %107 {offsets = [0, 0], sizes = [10, 32], strides = [1, 1]} : vector<32x32xf32> to vector<10x32xf32>
    %cst_52 = arith.constant dense<0xFF800000> : vector<32xf32>
    %109 = vector.multi_reduction <maximumf>, %108, %cst_52 [0] : vector<10x32xf32> to vector<32xf32>
    %110 = vector.shape_cast %109 : vector<32xf32> to vector<1x32xf32>
    %111 = vector.extract_strided_slice %107 {offsets = [16, 0], sizes = [10, 32], strides = [1, 1]} : vector<32x32xf32> to vector<10x32xf32>
    %cst_53 = arith.constant dense<0xFF800000> : vector<32xf32>
    %112 = vector.multi_reduction <maximumf>, %111, %cst_53 [0] : vector<10x32xf32> to vector<32xf32>
    %113 = vector.shape_cast %112 : vector<32xf32> to vector<1x32xf32>
    %114 = tpu.concatenate %110, %113 in 0 : vector<1x32xf32>, vector<1x32xf32> -> vector<2x32xf32>
    %115 = tpu.concatenate %30, %65, %114 in 1 : vector<2x32xf32>, vector<2x32xf32>, vector<2x32xf32> -> vector<2x96xf32>
    %c0_54 = arith.constant 0 : index
    %c0_55 = arith.constant 0 : index
    %116 = vector.load %arg5[%c0_54, %c0_55] : memref<96x32xf32, #tpu.memory_space<vmem>>, vector<96x32xf32>
    %cst_56 = arith.constant dense<0.000000e+00> : vector<2x32xf32>
    %117 = tpu.matmul %115, %116, %cst_56 {dimension_numbers = #tpu.dot_dimension_numbers<[1], [0], [0], [1], [0, 0, 1, 1], [], []>} : vector<2x96xf32>, vector<96x32xf32>, vector<2x32xf32> -> vector<2x32xf32>
    %c0_57 = arith.constant 0 : index
    %c0_58 = arith.constant 0 : index
    %118 = vector.load %arg6[%c0_57, %c0_58] : memref<1x32xf32, #tpu.memory_space<vmem>>, vector<1x32xf32>
    %119 = vector.broadcast %118 : vector<1x32xf32> to vector<2x32xf32>
    %120 = arith.addf %117, %119 : vector<2x32xf32>
    %c0_59 = arith.constant 0 : index
    %c0_60 = arith.constant 0 : index
    %121 = vector.load %arg7[%c0_59, %c0_60] : memref<2x32xf32, #tpu.memory_space<vmem>>, vector<2x32xf32>
    tpu.vector_store %arg7[%c0_59, %c0_60], %120 {strides = array<i32>} : memref<2x32xf32, #tpu.memory_space<vmem>>, vector<2x32xf32>,
    return
  }
  func.func @transform_0(%arg0: i32) -> (i32, i32) {
    %c0_i32 = arith.constant 0 : i32
    %c0_i32_0 = arith.constant 0 : i32
    return %arg0, %c0_i32 : i32, i32
  }
  func.func @transform_1(%arg0: i32) -> (i32, i32) {
    %c0_i32 = arith.constant 0 : i32
    %c0_i32_0 = arith.constant 0 : i32
    %c0_i32_1 = arith.constant 0 : i32
    return %c0_i32, %c0_i32_0 : i32, i32
  }
  func.func @transform_2(%arg0: i32) -> (i32, i32, i32) {
    %c0_i32 = arith.constant 0 : i32
    %c0_i32_0 = arith.constant 0 : i32
    %c0_i32_1 = arith.constant 0 : i32
    %c0_i32_2 = arith.constant 0 : i32
    return %c0_i32, %c0_i32_0, %c0_i32_1 : i32, i32, i32
  }
  func.func @transform_3(%arg0: i32) -> (i32, i32, i32) {
    %c0_i32 = arith.constant 0 : i32
    %c0_i32_0 = arith.constant 0 : i32
    %c0_i32_1 = arith.constant 0 : i32
    %c0_i32_2 = arith.constant 0 : i32
    return %c0_i32, %c0_i32_0, %c0_i32_1 : i32, i32, i32
  }
  func.func @transform_4(%arg0: i32) -> (i32, i32) {
    %c0_i32 = arith.constant 0 : i32
    %c0_i32_0 = arith.constant 0 : i32
    %c0_i32_1 = arith.constant 0 : i32
    return %c0_i32, %c0_i32_0 : i32, i32
  }
  func.func @transform_5(%arg0: i32) -> (i32, i32) {
    %c0_i32 = arith.constant 0 : i32
    %c0_i32_0 = arith.constant 0 : i32
    %c0_i32_1 = arith.constant 0 : i32
    return %c0_i32, %c0_i32_0 : i32, i32
  }
  func.func @transform_6(%arg0: i32) -> (i32, i32) {
    %c0_i32 = arith.constant 0 : i32
    %c0_i32_0 = arith.constant 0 : i32
    return %arg0, %c0_i32 : i32, i32
  }
}

</mosaic_0001>

<bundles_post_ra>
// kernel: target_representation.1
= control target key start
LH: loop header
LB: loop body
LE: loop exit
PB: predicated region body
PF: predicated region fallthrough
CT: control target
= control target key end

     0   :  { %v1922_v2 = vmov 0   ;;  %vm71_vm0 = vcmask 1040384   ;;  %vm1923_vm1 = vmmov 1   ;;  %s2466_s0 = inlined_call_operand.vmem [shape: s32[32,1], index: 0, kind: input, shape index: {}]   ;;  %s2467_s1 = inlined_call_operand.vmem [shape: f32[25,32], index: 1, kind: input, shape index: {}]   ;;  %s2468_s2 = inlined_call_operand.vmem [shape: f32[6,96,32], index: 2, kind: input, shape index: {}]   ;;  %s2469_s3 = inlined_call_operand.vmem [shape: f32[6,1,32], index: 3, kind: input, shape index: {}]   ;;  %s2470_s4 = inlined_call_operand.vmem [shape: f32[96,32], index: 4, kind: input, shape index: {}]   ;;  %s2471_s5 = inlined_call_operand.vmem [shape: f32[1,32], index: 5, kind: input, shape index: {}]   ;;  %s2472_s6 = inlined_call_operand.hbm [shape: f32[2,32], index: 6, kind: output, shape index: {}]  }
   0x1   :  { %v26_v0 = vld [vmem:[%s2466_s0 + $0x10] sm:$0xff]  ;;  %v24_v1 = vld [vmem:[%s2466_s0] sm:$0xff]  ;;  %1897 = vset.pattern.permute.xlu1 %v1922_v2  ;;  %1896 = vset.pattern.permute.xlu0 %v1922_v2  ;;  %v55_v4 = vld [vmem:[%s2467_s1 + $0x8] sm:$0xff] }
   0x2   :  { %v54_v3 = vld [vmem:[%s2467_s1] sm:$0xff]  ;;  %37 = vperm.xlu1 %1897, %v26_v0   ;;  %31 = vperm.xlu0 %1896, %v24_v1   ;;  %v56_v6 = vld [vmem:[%s2467_s1 + $0x10] sm:$0xff]  ;;  %v57_v7 = vld [vmem:[%s2467_s1 + $0x18] sm:$0x1] }
   0x3   :  { %v1716_v5 = vpack.c.bf16 %v55_v4, %v54_v3  ;;  %v27_v8 = vld [vmem:[%s2466_s0 + $0x18] sm:$0xff]  ;;  %v25_v9 = vld [vmem:[%s2466_s0 + $0x8] sm:$0xff]  ;;  %v1720_v10 = vpack.c.bf16 %v57_v7, %v56_v6  ;;  %vm1721_vm2 = vmpackc.low %vm71_vm0, %vm1923_vm1 }
   0x5   :  { %1717 = vmatprep.subr.bf16.mxu0 %v1716_v5 }
   0x6   :  { %11 = vsyncpa [#allocation3], 0  ;;  %1719 = vmatpush3.bf16.msra.mxu0 %v1716_v5  ;;  %40 = vperm.xlu1 %1897, %v27_v8   ;;  %v28_v11 = vlaneseq  ;;  %vm58_vm3 = vcmask 203776   ;;  %v1924_v15 = vmov 0.0   ;;  %v1286_v22 = vld [vmem:[%s2468_s2 + $0x60] sm:$0xff]  ;;  %v1287_v23 = vld [vmem:[%s2468_s2 + $0x68] sm:$0xff] }
   0x7   :  { %34 = vperm.xlu0 %1896, %v25_v9   ;;  %1722 = vmatprep.subr.msk.bf16.mxu0 %vm1721_vm2, %v1720_v10  ;;  %v220_v24 = vld [vmem:[%s2468_s2] sm:$0xff]  ;;  %v1750_v25 = vpack.c.bf16 %v1287_v23, %v1286_v22  ;;  %v221_v26 = vld [vmem:[%s2468_s2 + $0x8] sm:$0xff]  ;;  %v1288_v27 = vld [vmem:[%s2468_s2 + $0x70] sm:$0xff]  ;;  %vm164_vm8 = vcmask 1046528   ;;  %vm174_vm9 = vcmask 1045504   ;;  %s1925_s0 = smov 32  }
   0x8   :  { %v29_v12 = vand.u32 127, %v28_v11  ;;  %v1289_v28 = vld [vmem:[%s2468_s2 + $0x78] sm:$0xff]  ;;  %v1726_v29 = vpack.c.bf16 %v221_v26, %v220_v24  ;;  %v222_v31 = vld [vmem:[%s2468_s2 + $0x10] sm:$0xff]  ;;  %v1290_v33 = vld [vmem:[%s2468_s2 + $0x80] sm:$0xff]  ;;  %s1926_s1 = smov 64   ;;  %vm210_vm10 = vcmask 261120  }
   0x9   :  { %v1754_v30 = vpack.c.bf16 %v1289_v28, %v1288_v27  ;;  %v223_v32 = vld [vmem:[%s2468_s2 + $0x18] sm:$0xff]  ;;  %v1291_v35 = vld [vmem:[%s2468_s2 + $0x88] sm:$0xff]  ;;  %v224_v36 = vld [vmem:[%s2468_s2 + $0x20] sm:$0xff]  ;;  %vm215_vm11 = vcmask 523264   ;;  %vm239_vm12 = vcmask 785408   ;;  %vm342_vm13 = vcmask 259072  }
   0xa   :  { %1725 = vmatpush3.bf16.msk.msra.mxu0 %vm1721_vm2, %v1720_v10  ;;  %v1730_v34 = vpack.c.bf16 %v223_v32, %v222_v31  ;;  %v225_v37 = vld [vmem:[%s2468_s2 + $0x28] sm:$0xff]  ;;  %1727 = vmatprep.subr.bf16.mxu1 %v1726_v29  ;;  %v1758_v38 = vpack.c.bf16 %v1291_v35, %v1290_v33  ;;  %v1292_v40 = vld [vmem:[%s2468_s2 + $0x90] sm:$0xff]  ;;  %v1293_v41 = vld [vmem:[%s2468_s2 + $0x98] sm:$0xff]  ;;  %vm650_vm14 = vcmask 257024   ;;  %vm1136_vm15 = vcmask 254976  }
   0xb   :  { %1751 = vmatprep.subr.bf16.mxu0 %v1750_v25  ;;  %1729 = vmatpush3.bf16.msra.mxu1 %v1726_v29  ;;  %v1734_v39 = vpack.c.bf16 %v225_v37, %v224_v36  ;;  %v1762_v42 = vpack.c.bf16 %v1293_v41, %v1292_v40  ;;  %v226_v43 = vld [vmem:[%s2468_s2 + $0x30] sm:$0xff]  ;;  %v227_v44 = vld [vmem:[%s2468_s2 + $0x38] sm:$0xff]  ;;  %v1294_v46 = vld [vmem:[%s2468_s2 + $0xa0] sm:$0xff]  ;;  %vm1928_vm1 = vmmov 0  }
   0xc   :  { %1731 = vmatprep.subr.bf16.mxu1 %v1730_v34  ;;  %v1738_v45 = vpack.c.bf16 %v227_v44, %v226_v43  ;;  %v1295_v47 = vld [vmem:[%s2468_s2 + $0xa8] sm:$0xff]  ;;  %v228_v49 = vld [vmem:[%s2468_s2 + $0x40] sm:$0xff]  ;;  %v1296_v52 = vld [vmem:[%s2468_s2 + $0xb0] sm:$0xff] }
   0xd   :  { %v1766_v48 = vpack.c.bf16 %v1295_v47, %v1294_v46  ;;  %v229_v50 = vld [vmem:[%s2468_s2 + $0x48] sm:$0xff]  ;;  %v1297_v53 = vld [vmem:[%s2468_s2 + $0xb8] sm:$0xff]  ;;  %v230_v55 = vld [vmem:[%s2468_s2 + $0x50] sm:$0xff] }
   0xe   :  { %v1742_v51 = vpack.c.bf16 %v229_v50, %v228_v49  ;;  %v1770_v54 = vpack.c.bf16 %v1297_v53, %v1296_v52  ;;  %v231_v56 = vld [vmem:[%s2468_s2 + $0x58] sm:$0xff]  ;;  %v1322_v59 = vld [vmem:[%s2468_s2 + $0x120] sm:$0xff]  ;;  %v1323_v60 = vld [vmem:[%s2468_s2 + $0x128] sm:$0xff] }
   0xf   :  { %1733 = vmatpush3.bf16.msra.mxu1 %v1730_v34  ;;  %v1746_v57 = vpack.c.bf16 %v231_v56, %v230_v55  ;;  %v1798_v0 = vpack.c.bf16 %v1323_v60, %v1322_v59  ;;  %v1325_v26 = vld [vmem:[%s2468_s2 + $0x138] sm:$0xff]  ;;  %v1326_v33 = vld [vmem:[%s2468_s2 + $0x140] sm:$0xff]  ;;  %v1327_v34 = vld [vmem:[%s2468_s2 + $0x148] sm:$0xff] }
  0x10   :  { %1735 = vmatprep.subr.bf16.mxu1 %v1734_v39  ;;  %v1328_v40 = vld [vmem:[%s2468_s2 + $0x150] sm:$0xff]  ;;  %v1329_v41 = vld [vmem:[%s2468_s2 + $0x158] sm:$0xff]  ;;  %v1330_v43 = vld [vmem:[%s2468_s2 + $0x160] sm:$0xff] }
  0x11   :  { %v1331_v44 = vld [vmem:[%s2468_s2 + $0x168] sm:$0xff]  ;;  %v1332_v46 = vld [vmem:[%s2468_s2 + $0x170] sm:$0xff]  ;;  %v1333_v47 = vld [vmem:[%s2468_s2 + $0x178] sm:$0xff] }
  0x12   :  { %v1304_v49 = vld [vmem:[%s2468_s2 + $0xc0] sm:$0xff]  ;;  %v1305_v50 = vld [vmem:[%s2468_s2 + $0xc8] sm:$0xff]  ;;  %v1307_v53 = vld [vmem:[%s2468_s2 + $0xd8] sm:$0xff] }
  0x13   :  { %1737 = vmatpush3.bf16.msra.mxu1 %v1734_v39  ;;  %v1774_v52 = vpack.c.bf16 %v1305_v50, %v1304_v49  ;;  %v1308_v55 = vld [vmem:[%s2468_s2 + $0xe0] sm:$0xff]  ;;  %v1309_v56 = vld [vmem:[%s2468_s2 + $0xe8] sm:$0xff]  ;;  %v1311_v59 = vld [vmem:[%s2468_s2 + $0xf8] sm:$0xff] }
  0x14   :  { %1739 = vmatprep.subr.bf16.mxu1 %v1738_v45 }
  0x17   :  { %1741 = vmatpush3.bf16.msra.mxu1 %v1738_v45  ;;  %v1814_v45 = vpack.c.bf16 %v1331_v44, %v1330_v43 }
  0x18   :  { %1743 = vmatprep.subr.bf16.mxu1 %v1742_v51 }
  0x1b   :  { %1745 = vmatpush3.bf16.msra.mxu1 %v1742_v51  ;;  %v1306_v51 = vld [vmem:[%s2468_s2 + $0xd0] sm:$0xff] }
  0x1c   :  { %1747 = vmatprep.subr.bf16.mxu1 %v1746_v57 }
  0x1f   :  { %1749 = vmatpush3.bf16.msra.mxu1 %v1746_v57  ;;  %v1782_v57 = vpack.c.bf16 %v1309_v56, %v1308_v55 }
  0x20   :  { %1775 = vmatprep.subr.bf16.mxu1 %v1774_v52 }
  0x81   :  { %v38_v13 = vpop.permute.xlu1 %37  ;;  %v32_v14 = vpop.permute.xlu0 %31 }
  0x82   :  { %vm42_vm4 = vcmp.eq.s32.totalorder %v29_v12, %v32_v14  ;;  %vm44_vm5 = vcmp.eq.s32.totalorder %v29_v12, %v38_v13 }
  0x83   :  { %v1272_v16 = vsel %vm42_vm4, 1.0, %v1924_v15  ;;  %v1274_v19 = vsel %vm44_vm5, 1.0, %v1924_v15 }
  0x84   :  { %1503 = vmatprep.mubr.msk.f32.mxu0 %vm58_vm3, %v1272_v16 }
  0x85   :  { %v41_v17 = vpop.permute.xlu1 %40 }
  0x86   :  { %v35_v18 = vpop.permute.xlu0 %34  ;;  %vm45_vm7 = vcmp.eq.s32.totalorder %v29_v12, %v41_v17 }
  0x87   :  { %vm43_vm6 = vcmp.eq.s32.totalorder %v29_v12, %v35_v18  ;;  %v1275_v21 = vsel %vm45_vm7, 1.0, %v1924_v15 }
  0x88   :  { %v1273_v20 = vsel %vm43_vm6, 1.0, %v1924_v15 }
  0x89   :  { %1504 = vmatmul.mubr.msk.f32.vlgmr.msra.gmra.mrb[0].mxu0 %vm58_vm3, %v1273_v20 }
  0x8a   :  { %1506 = vmatprep.mubr.msk.f32.mxu0 %vm58_vm3, %v1274_v19  ;;  %1753 = vmatpush3.bf16.msra.mxu0 %v1750_v25  ;;  %v1324_v25 = vld [vmem:[%s2468_s2 + $0x130] sm:$0xff] }
  0x8b   :  { %1755 = vmatprep.subr.bf16.mxu0 %v1754_v30  ;;  %v1802_v29 = vpack.c.bf16 %v1325_v26, %v1324_v25 }
  0x8d   :  { %1507 = vmatmul.mubr.msk.f32.gmra.mrb[2].mxu0 %vm58_vm3, %v1275_v21 }
  0x8e   :  { %1757 = vmatpush3.bf16.msra.mxu0 %v1754_v30 }
  0x8f   :  { %1759 = vmatprep.subr.bf16.mxu0 %v1758_v38 }
  0x92   :  { %1761 = vmatpush3.bf16.msra.mxu0 %v1758_v38  ;;  %v1806_v38 = vpack.c.bf16 %v1327_v34, %v1326_v33 }
  0x93   :  { %1763 = vmatprep.subr.bf16.mxu0 %v1762_v42 }
  0x96   :  { %1765 = vmatpush3.bf16.msra.mxu0 %v1762_v42  ;;  %v1810_v42 = vpack.c.bf16 %v1329_v41, %v1328_v40 }
  0x97   :  { %1767 = vmatprep.subr.bf16.mxu0 %v1766_v48 }
  0x9a   :  { %1769 = vmatpush3.bf16.msra.mxu0 %v1766_v48  ;;  %v1818_v48 = vpack.c.bf16 %v1333_v47, %v1332_v46 }
  0x9b   :  { %1771 = vmatprep.subr.bf16.mxu0 %v1770_v54 }
  0x9e   :  { %1773 = vmatpush3.bf16.msra.mxu0 %v1770_v54  ;;  %v1778_v54 = vpack.c.bf16 %v1307_v53, %v1306_v51 }
  0x9f   :  { %1799 = vmatprep.subr.bf16.mxu0 %v1798_v0 }
 0x15c   :  { %v1505_v58 = vpop.f32.mrb[0].mxu0 }
 0x15d   :  { %v166_v61 = vrot.slane %v1505_v58, 1  ;;  %v176_v62 = vrot.slane %v1505_v58, 2  ;;  %v141_v63 = vpop.f32.mrb[1].mxu0 }
 0x15e   :  { %v165_v1 = vrot.slane %v141_v63, 1  ;;  %v175_v2 = vrot.slane %v141_v63, 2 }
 0x160   :  { %v1508_v3 = vpop.f32.mrb[2].mxu0  ;;  %v167_v4 = vsel %vm164_vm8, %v165_v1, %v166_v61  ;;  %v177_v5 = vsel %vm174_vm9, %v175_v2, %v176_v62  ;;  %v1299_v1 = vld [vmem:[%s2469_s3 + $0x1] ss:$0 sm:$0xff] }
 0x161   :  { %v170_v6 = vrot.slane %v1508_v3, 1  ;;  %v180_v7 = vrot.slane %v1508_v3, 2  ;;  %185 = vrot.lane.b32.xlu0 %v167_v4, %s1925_s0  ;;  %v151_v8 = vpop.f32.mrb[3].mxu0  ;;  %v1314_v4 = vld [vmem:[%s2468_s2 + $0x110] sm:$0xff] }
 0x162   :  { %v168_v9 = vrot.slane %v151_v8, 1  ;;  %v178_v10 = vrot.slane %v151_v8, 2 }
 0x163   :  { %v173_v11 = vsel %vm164_vm8, %v170_v6, 0.0  ;;  %v183_v17 = vsel %vm174_vm9, %v180_v7, 0.0 }
 0x164   :  { %191 = vrot.lane.b32.xlu1 %v173_v11, %s1925_s0  ;;  %v169_v12 = vsel %vm164_vm8, %v166_v61, %v168_v9  ;;  %v171_v13 = vsel %vm164_vm8, %v168_v9, %v170_v6  ;;  %v179_v14 = vsel %vm174_vm9, %v176_v62, %v178_v10  ;;  %v181_v16 = vsel %vm174_vm9, %v178_v10, %v180_v7  ;;  %v1312_v61 = vld [vmem:[%s2468_s2 + $0x100] sm:$0xff]  ;;  %v1313_v62 = vld [vmem:[%s2468_s2 + $0x108] sm:$0xff] }
 0x165   :  { %198 = vrot.lane.b32.xlu0 %v177_v5, %s1926_s1  ;;  %v1315_v5 = vld [vmem:[%s2468_s2 + $0x118] sm:$0xff] }
 0x166   :  { %v1794_v10 = vpack.c.bf16 %v1315_v5, %v1314_v4 }
 0x168   :  { %187 = vrot.lane.b32.xlu1 %v169_v12, %s1925_s0 }
 0x169   :  { %189 = vrot.lane.b32.xlu0 %v171_v13, %s1925_s0 }
 0x16c   :  { %200 = vrot.lane.b32.xlu1 %v179_v14, %s1926_s1 }
 0x16d   :  { %202 = vrot.lane.b32.xlu0 %v181_v16, %s1926_s1 }
 0x170   :  { %204 = vrot.lane.b32.xlu1 %v183_v17, %s1926_s1 }
 0x1d3   :  { %v186_v18 = vpop.permute.xlu0 %185 }
 0x1d4   :  { %v211_v20 = vsel %vm210_vm10, %v141_v63, %v186_v18  ;;  %v1790_v63 = vpack.c.bf16 %v1313_v62, %v1312_v61 }
 0x1d6   :  { %v192_v19 = vpop.permute.xlu1 %191 }
 0x1d7   :  { %v199_v21 = vpop.permute.xlu0 %198  ;;  %v214_v36 = vsel %vm210_vm10, %v1508_v3, %v192_v19 }
 0x1d8   :  { %v216_v22 = vsel %vm215_vm11, %v211_v20, %v199_v21 }
 0x1d9   :  { %1533 = vmatprep.mubr.msk.f32.mxu1 %vm239_vm12, %v216_v22  ;;  %1563 = vmatprep.mubr.msk.f32.mxu0 %vm239_vm12, %v216_v22 }
 0x1da   :  { %v188_v23 = vpop.permute.xlu1 %187 }
 0x1db   :  { %v190_v24 = vpop.permute.xlu0 %189  ;;  %v212_v27 = vsel %vm210_vm10, %v1505_v58, %v188_v23  ;;  %v1310_v58 = vld [vmem:[%s2468_s2 + $0xf0] sm:$0xff] }
 0x1dc   :  { %v213_v30 = vsel %vm210_vm10, %v151_v8, %v190_v24  ;;  %v1786_v60 = vpack.c.bf16 %v1311_v59, %v1310_v58 }
 0x1de   :  { %v201_v28 = vpop.permute.xlu1 %200 }
 0x1df   :  { %v217_v31 = vsel %vm215_vm11, %v212_v27, %v201_v28  ;;  %v203_v32 = vpop.permute.xlu0 %202 }
 0x1e0   :  { %v218_v35 = vsel %vm215_vm11, %v213_v30, %v203_v32  ;;  %1534 = vmatmul.mubr.msk.f32.vlgmr.msra.gmra.mrb[0].mxu1 %vm239_vm12, %v217_v31  ;;  %1564 = vmatmul.mubr.msk.f32.vlgmr.msra.gmra.mrb[4].mxu0 %vm239_vm12, %v217_v31  ;;  %v1341_v30 = vld [vmem:[%s2468_s2 + $0x188] sm:$0xff] }
 0x1e1   :  { %1801 = vmatpush3.bf16.msra.mxu0 %v1798_v0  ;;  %1536 = vmatprep.mubr.msk.f32.mxu1 %vm239_vm12, %v218_v35  ;;  %v1281_v0 = vld [vmem:[%s2469_s3] ss:$0 sm:$0xff] }
 0x1e2   :  { %1566 = vmatprep.mubr.msk.f32.mxu0 %vm239_vm12, %v218_v35  ;;  %v205_v37 = vpop.permute.xlu1 %204  ;;  %1803 = vmatprep.subr.bf16.mxu0 %v1802_v29 }
 0x1e3   :  { %v219_v39 = vsel %vm215_vm11, %v214_v36, %v205_v37  ;;  %1777 = vmatpush3.bf16.msra.mxu1 %v1774_v52 }
 0x1e4   :  { %1537 = vmatmul.mubr.msk.f32.gmra.mrb[2].mxu1 %vm239_vm12, %v219_v39  ;;  %1567 = vmatmul.mubr.msk.f32.gmra.mrb[6].mxu0 %vm239_vm12, %v219_v39 }
 0x1e5   :  { %1805 = vmatpush3.bf16.msra.mxu0 %v1802_v29  ;;  %1623 = vmatprep.mubr.msk.f32.mxu0 %vm239_vm12, %v216_v22  ;;  %v1340_v29 = vld [vmem:[%s2468_s2 + $0x180] sm:$0xff] }
 0x1e6   :  { %1807 = vmatprep.subr.bf16.mxu0 %v1806_v38  ;;  %1779 = vmatprep.subr.bf16.mxu1 %v1778_v54 }
 0x1e7   :  { %1781 = vmatpush3.bf16.msra.mxu1 %v1778_v54 }
 0x1e8   :  { %1783 = vmatprep.subr.bf16.mxu1 %v1782_v57 }
 0x1e9   :  { %1809 = vmatpush3.bf16.msra.mxu0 %v1806_v38  ;;  %v2199_v38 = vpack.c.bf16 %v1341_v30, %v1340_v29 }
 0x1ea   :  { %1811 = vmatprep.subr.bf16.mxu0 %v1810_v42 }
 0x1eb   :  { %1785 = vmatpush3.bf16.msra.mxu1 %v1782_v57 }
 0x1ec   :  { %1787 = vmatprep.subr.bf16.mxu1 %v1786_v60 }
 0x1ed   :  { %1813 = vmatpush3.bf16.msra.mxu0 %v1810_v42 }
 0x1ee   :  { %1815 = vmatprep.subr.bf16.mxu0 %v1814_v45 }
 0x1ef   :  { %1789 = vmatpush3.bf16.msra.mxu1 %v1786_v60 }
 0x1f0   :  { %1791 = vmatprep.subr.bf16.mxu1 %v1790_v63 }
 0x1f1   :  { %1817 = vmatpush3.bf16.msra.mxu0 %v1814_v45 }
 0x1f2   :  { %1819 = vmatprep.subr.bf16.mxu0 %v1818_v48 }
 0x1f3   :  { %1793 = vmatpush3.bf16.msra.mxu1 %v1790_v63 }
 0x1f4   :  { %1795 = vmatprep.subr.bf16.mxu1 %v1794_v10 }
 0x1f5   :  { %1821 = vmatpush3.bf16.msra.mxu0 %v1818_v48 }
 0x1f7   :  { %1797 = vmatpush3.bf16.msra.mxu1 %v1794_v10 }
 0x1f8   :  { %1624 = vmatmul.mubr.msk.f32.vlgmr.msra.gmra.mrb[8].mxu0 %vm239_vm12, %v217_v31  ;;  %1823 = vmatprep.subr.bf16.mxu1 %v2199_v38 }
 0x1f9   :  { %1626 = vmatprep.mubr.msk.f32.mxu0 %vm239_vm12, %v218_v35 }
 0x1fc   :  { %1627 = vmatmul.mubr.msk.f32.gmra.mrb[10].mxu0 %vm239_vm12, %v219_v39 }
 0x2b3   :  { %v1535_v2 = vpop.f32.mrb[0].mxu1  ;;  %v1565_v3 = vpop.f32.mrb[4].mxu0 }
 0x2b4   :  { %v324_v6 = vadd.f32 %v1535_v2, %v1281_v0  ;;  %v454_v7 = vadd.f32 %v1565_v3, %v1299_v1  ;;  %v318_v8 = vpop.f32.mrb[1].mxu1  ;;  %v448_v9 = vpop.f32.mrb[5].mxu0 }
 0x2b5   :  { %v319_v11 = vadd.f32 %v1281_v0, %v318_v8  ;;  %v449_v12 = vadd.f32 %v1299_v1, %v448_v9 }
 0x2b6   :  { %v338_v13 = vmax.f32 %v324_v6, 0.0  ;;  %v2180_v14 = vmax.f32 %v454_v7, 0.0 }
 0x2b7   :  { %v337_v16 = vmax.f32 %v319_v11, 0.0  ;;  %v2182_v17 = vmax.f32 %v449_v12, 0.0  ;;  %v1538_v18 = vpop.f32.mrb[2].mxu1  ;;  %v1568_v19 = vpop.f32.mrb[6].mxu0 }
 0x2b8   :  { %v343_v20 = vsel %vm342_vm13, %v338_v13, -inf  ;;  %v476_v21 = vrot.slane %v2180_v14, 1  ;;  %v334_v22 = vadd.f32 %v1538_v18, %v1281_v0  ;;  %v328_v23 = vpop.f32.mrb[3].mxu1  ;;  %v458_v24 = vpop.f32.mrb[7].mxu0  ;;  %v485_v25 = vrot.slane %v2180_v14, 2 }
 0x2b9   :  { %v341_v26 = vsel %vm210_vm10, %v337_v16, -inf  ;;  %v475_v27 = vrot.slane %v2182_v17, 1  ;;  %v464_v28 = vadd.f32 %v1568_v19, %v1299_v1  ;;  %v329_v33 = vadd.f32 %v1281_v0, %v328_v23  ;;  %v1335_v0 = vld [vmem:[%s2469_s3 + $0x3] ss:$0 sm:$0xff] }
 0x2ba   :  { %v344_v31 = vmax.f32 %v341_v26, %v343_v20  ;;  %v340_v32 = vmax.f32 %v334_v22, 0.0  ;;  %v459_v34 = vadd.f32 %v1299_v1, %v458_v24  ;;  %v484_v35 = vrot.slane %v2182_v17, 2 }
 0x2bb   :  { %v2196_v36 = vmax.f32 %v464_v28, 0.0  ;;  %v477_v37 = vsel %vm164_vm8, %v475_v27, %v476_v21  ;;  %v339_v41 = vmax.f32 %v329_v33, 0.0 }
 0x2bc   :  { %v345_v39 = vrot.slane %v344_v31, 4  ;;  %v352_v40 = vsel %vm342_vm13, %v340_v32, -inf  ;;  %v2202_v42 = vmax.f32 %v459_v34, 0.0  ;;  %494 = vrot.lane.b32.xlu0 %v477_v37, %s1925_s0  ;;  %v486_v48 = vsel %vm174_vm9, %v484_v35, %v485_v25 }
 0x2bd   :  { %v351_v44 = vsel %vm210_vm10, %v339_v41, -inf  ;;  %v480_v46 = vrot.slane %v2196_v36, 1  ;;  %v489_v54 = vrot.slane %v2196_v36, 2 }
 0x2be   :  { %v346_v43 = vmax.f32 %v344_v31, %v345_v39  ;;  %v478_v45 = vrot.slane %v2202_v42, 1  ;;  %v353_v47 = vmax.f32 %v351_v44, %v352_v40  ;;  %v487_v50 = vrot.slane %v2202_v42, 2  ;;  %v1342_v44 = vld [vmem:[%s2468_s2 + $0x190] sm:$0xff] }
 0x2bf   :  { %v483_v62 = vsel %vm164_vm8, %v480_v46, 0.0  ;;  %v492_v6 = vsel %vm174_vm9, %v489_v54, 0.0 }
 0x2c0   :  { %v347_v49 = vrot.slane %v346_v43, 2  ;;  %507 = vrot.lane.b32.xlu0 %v486_v48, %s1926_s1  ;;  %v479_v51 = vsel %vm164_vm8, %v476_v21, %v478_v45  ;;  %v354_v52 = vrot.slane %v353_v47, 4  ;;  %v481_v56 = vsel %vm164_vm8, %v478_v45, %v480_v46  ;;  %v1343_v45 = vld [vmem:[%s2468_s2 + $0x198] sm:$0xff] }
 0x2c1   :  { %496 = vrot.lane.b32.xlu1 %v479_v51, %s1925_s0  ;;  %v488_v57 = vsel %vm174_vm9, %v485_v25, %v487_v50  ;;  %v490_v61 = vsel %vm174_vm9, %v487_v50, %v489_v54  ;;  %v1344_v50 = vld [vmem:[%s2468_s2 + $0x1a0] sm:$0xff]  ;;  %v1345_v51 = vld [vmem:[%s2468_s2 + $0x1a8] sm:$0xff] }
 0x2c2   :  { %v348_v53 = vmax.f32 %v346_v43, %v347_v49  ;;  %v355_v55 = vmax.f32 %v353_v47, %v354_v52 }
 0x2c4   :  { %498 = vrot.lane.b32.xlu0 %v481_v56, %s1925_s0  ;;  %v356_v58 = vrot.slane %v355_v55, 2  ;;  %v349_v59 = vrot.slane %v348_v53, 1  ;;  %v1346_v56 = vld [vmem:[%s2468_s2 + $0x1b0] sm:$0xff] }
 0x2c5   :  { %509 = vrot.lane.b32.xlu1 %v488_v57, %s1926_s1  ;;  %v1347_v57 = vld [vmem:[%s2468_s2 + $0x1b8] sm:$0xff] }
 0x2c6   :  { %v357_v60 = vmax.f32 %v355_v55, %v356_v58  ;;  %v350_v2 = vmax.f32 %v348_v53, %v349_v59  ;;  %v1830_v55 = vpack.c.bf16 %v1345_v51, %v1344_v50  ;;  %v1834_v58 = vpack.c.bf16 %v1347_v57, %v1346_v56  ;;  %v1364_v56 = vld [vmem:[%s2468_s2 + $0x210] sm:$0xff]  ;;  %v1365_v57 = vld [vmem:[%s2468_s2 + $0x218] sm:$0xff] }
 0x2c8   :  { %511 = vrot.lane.b32.xlu0 %v490_v61, %s1926_s1  ;;  %v358_v63 = vrot.slane %v357_v60, 1  ;;  %v1349_v61 = vld [vmem:[%s2468_s2 + $0x1c8] sm:$0xff] }
 0x2c9   :  { %500 = vrot.lane.b32.xlu1 %v483_v62, %s1925_s0 }
 0x2ca   :  { %v359_v3 = vmax.f32 %v357_v60, %v358_v63  ;;  %v1348_v60 = vld [vmem:[%s2468_s2 + $0x1c0] sm:$0xff]  ;;  %v1351_v63 = vld [vmem:[%s2468_s2 + $0x1d8] sm:$0xff] }
 0x2cb   :  { %v1625_v1 = vpop.f32.mrb[8].mxu0  ;;  %v1838_v62 = vpack.c.bf16 %v1349_v61, %v1348_v60  ;;  %v1353_v60 = vld [vmem:[%s2469_s3 + $0x4] ss:$0 sm:$0xff] }
 0x2cc   :  { %v762_v4 = vadd.f32 %v1625_v1, %v1335_v0  ;;  %v756_v5 = vpop.f32.mrb[9].mxu0  ;;  %v2229_v8 = vsel %vm71_vm0, %v350_v2, %v359_v3  ;;  %v1366_v61 = vld [vmem:[%s2468_s2 + $0x220] sm:$0xff] }
 0x2cd   :  { %v757_v7 = vadd.f32 %v1335_v0, %v756_v5  ;;  %513 = vrot.lane.b32.xlu1 %v492_v6, %s1926_s1 }
 0x2ce   :  { %v2231_v9 = vmax.f32 %v762_v4, 0.0 }
 0x2cf   :  { %v2233_v10 = vmax.f32 %v757_v7, 0.0  ;;  %v1628_v11 = vpop.f32.mrb[10].mxu0 }
 0x2d0   :  { %v784_v12 = vrot.slane %v2231_v9, 1  ;;  %v772_v13 = vadd.f32 %v1628_v11, %v1335_v0  ;;  %v766_v16 = vpop.f32.mrb[11].mxu0  ;;  %v793_v21 = vrot.slane %v2231_v9, 2 }
 0x2d1   :  { %v783_v18 = vrot.slane %v2233_v10, 1  ;;  %v767_v19 = vadd.f32 %v1335_v0, %v766_v16  ;;  %v792_v22 = vrot.slane %v2233_v10, 2 }
 0x2d2   :  { %v2237_v20 = vmax.f32 %v772_v13, 0.0 }
 0x2d3   :  { %v2241_v23 = vmax.f32 %v767_v19, 0.0  ;;  %v785_v24 = vsel %vm164_vm8, %v783_v18, %v784_v12  ;;  %v794_v28 = vsel %vm174_vm9, %v792_v22, %v793_v21 }
 0x2d4   :  { %802 = vrot.lane.b32.xlu0 %v785_v24, %s1925_s0  ;;  %v788_v25 = vrot.slane %v2237_v20, 1  ;;  %v797_v31 = vrot.slane %v2237_v20, 2  ;;  %v1360_v24 = vld [vmem:[%s2468_s2 + $0x1f0] sm:$0xff] }
 0x2d5   :  { %v786_v26 = vrot.slane %v2241_v23, 1  ;;  %v795_v29 = vrot.slane %v2241_v23, 2 }
 0x2d6   :  { %v791_v27 = vsel %vm164_vm8, %v788_v25, 0.0  ;;  %v800_v35 = vsel %vm174_vm9, %v797_v31, 0.0 }
 0x2d7   :  { %808 = vrot.lane.b32.xlu1 %v791_v27, %s1925_s0  ;;  %v787_v30 = vsel %vm164_vm8, %v784_v12, %v786_v26  ;;  %v789_v32 = vsel %vm164_vm8, %v786_v26, %v788_v25  ;;  %v796_v33 = vsel %vm174_vm9, %v793_v21, %v795_v29  ;;  %v798_v34 = vsel %vm174_vm9, %v795_v29, %v797_v31  ;;  %v1362_v27 = vld [vmem:[%s2468_s2 + $0x200] sm:$0xff] }
 0x2d8   :  { %815 = vrot.lane.b32.xlu0 %v794_v28, %s1926_s1  ;;  %v1363_v28 = vld [vmem:[%s2468_s2 + $0x208] sm:$0xff] }
 0x2d9   :  { %v1854_v29 = vpack.c.bf16 %v1363_v28, %v1362_v27 }
 0x2db   :  { %804 = vrot.lane.b32.xlu1 %v787_v30, %s1925_s0  ;;  %v1317_v30 = vld [vmem:[%s2469_s3 + $0x2] ss:$0 sm:$0xff] }
 0x2dc   :  { %806 = vrot.lane.b32.xlu0 %v789_v32, %s1925_s0 }
 0x2df   :  { %817 = vrot.lane.b32.xlu1 %v796_v33, %s1926_s1 }
 0x2e0   :  { %819 = vrot.lane.b32.xlu0 %v798_v34, %s1926_s1 }
 0x2e3   :  { %821 = vrot.lane.b32.xlu1 %v800_v35, %s1926_s1 }
 0x32e   :  { %v495_v37 = vpop.permute.xlu0 %494 }
 0x32f   :  { %v519_v39 = vsel %vm210_vm10, %v2182_v17, %v495_v37  ;;  %v1826_v17 = vpack.c.bf16 %v1343_v45, %v1342_v44 }
 0x332   :  { %v508_v40 = vpop.permute.xlu0 %507 }
 0x333   :  { %v523_v41 = vsel %vm215_vm11, %v519_v39, %v508_v40  ;;  %v497_v43 = vpop.permute.xlu1 %496 }
 0x334   :  { %1593 = vmatprep.mubr.msk.f32.mxu1 %vm239_vm12, %v523_v41  ;;  %v520_v47 = vsel %vm210_vm10, %v2180_v14, %v497_v43 }
 0x336   :  { %v499_v46 = vpop.permute.xlu0 %498 }
 0x337   :  { %v510_v48 = vpop.permute.xlu1 %509  ;;  %v521_v52 = vsel %vm210_vm10, %v2202_v42, %v499_v46 }
 0x338   :  { %v524_v49 = vsel %vm215_vm11, %v520_v47, %v510_v48 }
 0x339   :  { %1594 = vmatmul.mubr.msk.f32.vlgmr.msra.gmra.mrb[4].mxu1 %vm239_vm12, %v524_v49 }
 0x33a   :  { %v512_v53 = vpop.permute.xlu0 %511  ;;  %1825 = vmatpush3.bf16.msra.mxu1 %v2199_v38 }
 0x33b   :  { %v525_v14 = vsel %vm215_vm11, %v521_v52, %v512_v53  ;;  %v501_v54 = vpop.permute.xlu1 %500  ;;  %1827 = vmatprep.subr.bf16.mxu1 %v1826_v17 }
 0x33c   :  { %1596 = vmatprep.mubr.msk.f32.mxu1 %vm239_vm12, %v525_v14  ;;  %v522_v42 = vsel %vm210_vm10, %v2196_v36, %v501_v54  ;;  %v1350_v36 = vld [vmem:[%s2468_s2 + $0x1d0] sm:$0xff] }
 0x33d   :  { %v1842_v1 = vpack.c.bf16 %v1351_v63, %v1350_v36 }
 0x33e   :  { %1829 = vmatpush3.bf16.msra.mxu1 %v1826_v17 }
 0x33f   :  { %v514_v38 = vpop.permute.xlu1 %513  ;;  %1831 = vmatprep.subr.bf16.mxu1 %v1830_v55 }
 0x340   :  { %v526_v59 = vsel %vm215_vm11, %v522_v42, %v514_v38  ;;  %v1858_v38 = vpack.c.bf16 %v1365_v57, %v1364_v56  ;;  %v1166_v56 = vld [vmem:[%s2470_s4 + $0x8] sm:$0xff]  ;;  %v1167_v57 = vld [vmem:[%s2470_s4 + $0x10] sm:$0xff] }
 0x341   :  { %1597 = vmatmul.mubr.msk.f32.gmra.mrb[6].mxu1 %vm239_vm12, %v526_v59 }
 0x342   :  { %1833 = vmatpush3.bf16.msra.mxu1 %v1830_v55 }
 0x343   :  { %1835 = vmatprep.subr.bf16.mxu1 %v1834_v58 }
 0x346   :  { %v803_v0 = vpop.permute.xlu0 %802  ;;  %1837 = vmatpush3.bf16.msra.mxu1 %v1834_v58 }
 0x347   :  { %1839 = vmatprep.subr.bf16.mxu1 %v1838_v62  ;;  %v827_v3 = vsel %vm210_vm10, %v2233_v10, %v803_v0 }
 0x349   :  { %v809_v2 = vpop.permute.xlu1 %808 }
 0x34a   :  { %v816_v4 = vpop.permute.xlu0 %815  ;;  %1841 = vmatpush3.bf16.msra.mxu1 %v1838_v62  ;;  %v830_v19 = vsel %vm210_vm10, %v2237_v20, %v809_v2  ;;  %v1361_v20 = vld [vmem:[%s2468_s2 + $0x1f8] sm:$0xff]  ;;  %v1367_v62 = vld [vmem:[%s2468_s2 + $0x228] sm:$0xff] }
 0x34b   :  { %v831_v5 = vsel %vm215_vm11, %v827_v3, %v816_v4  ;;  %1843 = vmatprep.subr.bf16.mxu1 %v1842_v1  ;;  %v1850_v26 = vpack.c.bf16 %v1361_v20, %v1360_v24  ;;  %v1862_v63 = vpack.c.bf16 %v1367_v62, %v1366_v61  ;;  %v1170_v61 = vld [vmem:[%s2470_s4 + $0x28] sm:$0xff] }
 0x34c   :  { %1653 = vmatprep.mubr.msk.f32.mxu1 %vm239_vm12, %v831_v5 }
 0x34d   :  { %v805_v6 = vpop.permute.xlu1 %804 }
 0x34e   :  { %v807_v7 = vpop.permute.xlu0 %806  ;;  %1845 = vmatpush3.bf16.msra.mxu1 %v1842_v1  ;;  %v828_v11 = vsel %vm210_vm10, %v2231_v9, %v805_v6  ;;  %v1358_v9 = vld [vmem:[%s2468_s2 + $0x1e0] sm:$0xff]  ;;  %v1368_v6 = vld [vmem:[%s2468_s2 + $0x230] sm:$0xff] }
 0x34f   :  { %v829_v13 = vsel %vm210_vm10, %v2241_v23, %v807_v7  ;;  %v1359_v23 = vld [vmem:[%s2468_s2 + $0x1e8] sm:$0xff]  ;;  %v1369_v7 = vld [vmem:[%s2468_s2 + $0x238] sm:$0xff]  ;;  %s1929_s2 = smov [#allocation2]  }
 0x350   :  { %v1846_v25 = vpack.c.bf16 %v1359_v23, %v1358_v9 }
 0x351   :  { %v818_v12 = vpop.permute.xlu1 %817 }
 0x352   :  { %v832_v16 = vsel %vm215_vm11, %v828_v11, %v818_v12  ;;  %v820_v10 = vpop.permute.xlu0 %819  ;;  %1847 = vmatprep.subr.bf16.mxu0 %v1846_v25 }
 0x353   :  { %v833_v18 = vsel %vm215_vm11, %v829_v13, %v820_v10  ;;  %1654 = vmatmul.mubr.msk.f32.vlgmr.msra.gmra.mrb[8].mxu1 %vm239_vm12, %v832_v16  ;;  %1849 = vmatpush3.bf16.msra.mxu0 %v1846_v25  ;;  %v1866_v13 = vpack.c.bf16 %v1369_v7, %v1368_v6  ;;  %v1371_v7 = vld [vmem:[%s2469_s3 + $0x5] ss:$0 sm:$0xff] }
 0x354   :  { %1656 = vmatprep.mubr.msk.f32.mxu1 %vm239_vm12, %v833_v18  ;;  %1851 = vmatprep.subr.bf16.mxu0 %v1850_v26 }
 0x355   :  { %v822_v21 = vpop.permute.xlu1 %821 }
 0x356   :  { %v834_v22 = vsel %vm215_vm11, %v830_v19, %v822_v21 }
 0x357   :  { %1657 = vmatmul.mubr.msk.f32.gmra.mrb[10].mxu1 %vm239_vm12, %v834_v22  ;;  %1853 = vmatpush3.bf16.msra.mxu0 %v1850_v26 }
 0x358   :  { %1855 = vmatprep.subr.bf16.mxu0 %v1854_v29  ;;  %1713 = vmatprep.mubr.msk.f32.mxu1 %vm1928_vm1, %v1924_v15  ;;  %v1376_v15 = vld [vmem:[%s2471_s5] ss:$0 sm:$0xff] }
 0x35b   :  { %1857 = vmatpush3.bf16.msra.mxu0 %v1854_v29 }
 0x35c   :  { %1859 = vmatprep.subr.bf16.mxu0 %v1858_v38 }
 0x35f   :  { %1861 = vmatpush3.bf16.msra.mxu0 %v1858_v38 }
 0x360   :  { %1863 = vmatprep.subr.bf16.mxu0 %v1862_v63 }
 0x363   :  { %1865 = vmatpush3.bf16.msra.mxu0 %v1862_v63  ;;  %v1172_v63 = vld [vmem:[%s2470_s4 + $0x38] sm:$0xff] }
 0x364   :  { %1867 = vmatprep.subr.bf16.mxu0 %v1866_v13 }
 0x367   :  { %1869 = vmatpush3.bf16.msra.mxu0 %v1866_v13 }
 0x40c   :  { %v1595_v31 = vpop.f32.mrb[4].mxu1 }
 0x40d   :  { %v632_v32 = vadd.f32 %v1595_v31, %v1317_v30  ;;  %v626_v33 = vpop.f32.mrb[5].mxu1 }
 0x40e   :  { %v627_v34 = vadd.f32 %v1317_v30, %v626_v33 }
 0x40f   :  { %v646_v35 = vmax.f32 %v632_v32, 0.0 }
 0x410   :  { %v645_v37 = vmax.f32 %v627_v34, 0.0 }
 0x411   :  { %v651_v39 = vsel %vm650_vm14, %v646_v35, -inf }
 0x412   :  { %v649_v40 = vsel %vm210_vm10, %v645_v37, -inf }
 0x413   :  { %v652_v41 = vmax.f32 %v649_v40, %v651_v39 }
 0x414   :  { %v1598_v43 = vpop.f32.mrb[6].mxu1 }
 0x415   :  { %v653_v44 = vrot.slane %v652_v41, 4  ;;  %v642_v45 = vadd.f32 %v1598_v43, %v1317_v30  ;;  %v636_v46 = vpop.f32.mrb[7].mxu1 }
 0x416   :  { %v637_v47 = vadd.f32 %v1317_v30, %v636_v46 }
 0x417   :  { %v654_v48 = vmax.f32 %v652_v41, %v653_v44  ;;  %v648_v17 = vmax.f32 %v642_v45, 0.0 }
 0x418   :  { %v647_v49 = vmax.f32 %v637_v47, 0.0 }
 0x419   :  { %v660_v50 = vsel %vm650_vm14, %v648_v17, -inf  ;;  %v655_v52 = vrot.slane %v654_v48, 2 }
 0x41a   :  { %v659_v51 = vsel %vm210_vm10, %v647_v49, -inf }
 0x41b   :  { %v661_v53 = vmax.f32 %v659_v51, %v660_v50  ;;  %v656_v54 = vmax.f32 %v654_v48, %v655_v52 }
 0x41d   :  { %v662_v14 = vrot.slane %v661_v53, 4  ;;  %v657_v59 = vrot.slane %v656_v54, 1 }
 0x41f   :  { %v663_v55 = vmax.f32 %v661_v53, %v662_v14  ;;  %v658_v3 = vmax.f32 %v656_v54, %v657_v59 }
 0x421   :  { %v664_v42 = vrot.slane %v663_v55, 2 }
 0x423   :  { %v665_v58 = vmax.f32 %v663_v55, %v664_v42  ;;  %v1165_v55 = vld [vmem:[%s2470_s4] sm:$0xff]  ;;  %v1927_v42 = vmov 0.0|0.0  }
 0x424   :  { %1870 = vmatprep.subr.bf16.mxu1 %v1927_v42  ;;  %v1871_v38 = vpack.c.bf16 %v1166_v56, %v1165_v55 }
 0x425   :  { %v666_v36 = vrot.slane %v665_v58, 1 }
 0x426   :  { %v1655_v0 = vpop.f32.mrb[8].mxu1  ;;  %1872 = vmatpush3.bf16.msra.mxu1 %v1871_v38 }
 0x427   :  { %v940_v1 = vadd.f32 %v1655_v0, %v1353_v60  ;;  %v934_v2 = vpop.f32.mrb[9].mxu1  ;;  %v667_v4 = vmax.f32 %v665_v58, %v666_v36  ;;  %v1168_v58 = vld [vmem:[%s2470_s4 + $0x18] sm:$0xff]  ;;  %1873 = vmatprep.subr.bf16.mxu1 %v1927_v42  ;;  %v1171_v36 = vld [vmem:[%s2470_s4 + $0x30] sm:$0xff] }
 0x428   :  { %v935_v5 = vadd.f32 %v1353_v60, %v934_v2  ;;  %v1874_v59 = vpack.c.bf16 %v1168_v58, %v1167_v57  ;;  %v1880_v0 = vpack.c.bf16 %v1172_v63, %v1171_v36  ;;  %v1174_v2 = vld [vmem:[%s2470_s4 + $0x48] sm:$0xff] }
 0x429   :  { %v954_v11 = vmax.f32 %v940_v1, 0.0  ;;  %v668_v12 = vsel %vm71_vm0, %v658_v3, %v667_v4  ;;  %v1173_v1 = vld [vmem:[%s2470_s4 + $0x40] sm:$0xff]  ;;  %v1175_v4 = vld [vmem:[%s2470_s4 + $0x50] sm:$0xff] }
 0x42a   :  { %v953_v16 = vmax.f32 %v935_v5, 0.0  ;;  %v1658_v10 = vpop.f32.mrb[10].mxu1  ;;  %1875 = vmatpush3.bf16.msra.mxu1 %v1874_v59  ;;  %v1883_v3 = vpack.c.bf16 %v1174_v2, %v1173_v1  ;;  %v1176_v5 = vld [vmem:[%s2470_s4 + $0x58] sm:$0xff] }
 0x42b   :  { %v962_v18 = vrot.slane %v954_v11, 1  ;;  %v950_v19 = vadd.f32 %v1658_v10, %v1353_v60  ;;  %v944_v21 = vpop.f32.mrb[11].mxu1  ;;  %v971_v24 = vrot.slane %v954_v11, 2  ;;  %1876 = vmatprep.subr.bf16.mxu1 %v1927_v42  ;;  %v1886_v6 = vpack.c.bf16 %v1176_v5, %v1175_v4 }
 0x42c   :  { %v961_v22 = vrot.slane %v953_v16, 1  ;;  %v945_v9 = vadd.f32 %v1353_v60, %v944_v21  ;;  %v970_v25 = vrot.slane %v953_v16, 2  ;;  %v1169_v60 = vld [vmem:[%s2470_s4 + $0x20] sm:$0xff] }
 0x42d   :  { %v956_v23 = vmax.f32 %v950_v19, 0.0  ;;  %v1877_v62 = vpack.c.bf16 %v1170_v61, %v1169_v60 }
 0x42e   :  { %v955_v20 = vmax.f32 %v945_v9, 0.0  ;;  %v963_v26 = vsel %vm164_vm8, %v961_v22, %v962_v18  ;;  %v972_v30 = vsel %vm174_vm9, %v970_v25, %v971_v24 }
 0x42f   :  { %980 = vrot.lane.b32.xlu0 %v963_v26, %s1925_s0  ;;  %v966_v27 = vrot.slane %v956_v23, 1  ;;  %v975_v33 = vrot.slane %v956_v23, 2  ;;  %1878 = vmatpush3.bf16.msra.mxu1 %v1877_v62 }
 0x430   :  { %v964_v28 = vrot.slane %v955_v20, 1  ;;  %v973_v31 = vrot.slane %v955_v20, 2  ;;  %1879 = vmatprep.subr.bf16.mxu1 %v1927_v42 }
 0x431   :  { %v969_v29 = vsel %vm164_vm8, %v966_v27, 0.0  ;;  %v978_v39 = vsel %vm174_vm9, %v975_v33, 0.0 }
 0x432   :  { %986 = vrot.lane.b32.xlu1 %v969_v29, %s1925_s0  ;;  %v965_v32 = vsel %vm164_vm8, %v962_v18, %v964_v28  ;;  %v967_v34 = vsel %vm164_vm8, %v964_v28, %v966_v27  ;;  %v974_v35 = vsel %vm174_vm9, %v971_v24, %v973_v31  ;;  %v976_v37 = vsel %vm174_vm9, %v973_v31, %v975_v33 }
 0x433   :  { %993 = vrot.lane.b32.xlu0 %v972_v30, %s1926_s1  ;;  %1881 = vmatpush3.bf16.msra.mxu1 %v1880_v0 }
 0x434   :  { %1882 = vmatprep.subr.bf16.mxu1 %v1927_v42 }
 0x436   :  { %982 = vrot.lane.b32.xlu1 %v965_v32, %s1925_s0 }
 0x437   :  { %984 = vrot.lane.b32.xlu0 %v967_v34, %s1925_s0  ;;  %1884 = vmatpush3.bf16.msra.mxu1 %v1883_v3 }
 0x438   :  { %1885 = vmatprep.subr.bf16.mxu1 %v1927_v42 }
 0x43a   :  { %995 = vrot.lane.b32.xlu1 %v974_v35, %s1926_s1 }
 0x43b   :  { %997 = vrot.lane.b32.xlu0 %v976_v37, %s1926_s1  ;;  %1887 = vmatpush3.bf16.msra.mxu1 %v1886_v6 }
 0x43e   :  { %999 = vrot.lane.b32.xlu1 %v978_v39, %s1926_s1 }
 0x43f   :  { %1156 = vrot.lane.b32.xlu0 %v668_v12, %s1925_s0  ;;  %s1264_s0 = sshll.u32 %s1929_s2, 4  ;;  %s1265_s0 = int_to_ptr.vmem [resolvable:$true] %s1264_s0 }
 0x440   :  { %p1903_p1 = scmp.lt.s32.totalorder %s1265_s0, %s1265_s0 }
 0x4a1   :  { %v981_v40 = vpop.permute.xlu0 %980 }
 0x4a2   :  { %v1005_v43 = vsel %vm210_vm10, %v953_v16, %v981_v40 }
 0x4a4   :  { %v987_v41 = vpop.permute.xlu1 %986 }
 0x4a5   :  { %v994_v44 = vpop.permute.xlu0 %993  ;;  %v1008_v53 = vsel %vm210_vm10, %v956_v23, %v987_v41 }
 0x4a6   :  { %v1009_v45 = vsel %vm215_vm11, %v1005_v43, %v994_v44 }
 0x4a7   :  { %1683 = vmatprep.mubr.msk.f32.mxu0 %vm239_vm12, %v1009_v45 }
 0x4a8   :  { %v983_v46 = vpop.permute.xlu1 %982 }
 0x4a9   :  { %v985_v47 = vpop.permute.xlu0 %984  ;;  %v1006_v48 = vsel %vm210_vm10, %v954_v11, %v983_v46 }
 0x4aa   :  { %v1007_v49 = vsel %vm210_vm10, %v955_v20, %v985_v47 }
 0x4ac   :  { %v996_v17 = vpop.permute.xlu1 %995 }
 0x4ad   :  { %v1010_v50 = vsel %vm215_vm11, %v1006_v48, %v996_v17  ;;  %v998_v51 = vpop.permute.xlu0 %997 }
 0x4ae   :  { %v1011_v52 = vsel %vm215_vm11, %v1007_v49, %v998_v51  ;;  %1684 = vmatmul.mubr.msk.f32.vlgmr.msra.gmra.mrb[12].mxu0 %vm239_vm12, %v1010_v50 }
 0x4af   :  { %1686 = vmatprep.mubr.msk.f32.mxu0 %vm239_vm12, %v1011_v52 }
 0x4b0   :  { %v1000_v14 = vpop.permute.xlu1 %999 }
 0x4b1   :  { %v1012_v54 = vsel %vm215_vm11, %v1008_v53, %v1000_v14  ;;  %v1157_v46 = vpop.permute.xlu0 %1156 }
 0x4b2   :  { %1687 = vmatmul.mubr.msk.f32.gmra.mrb[14].mxu0 %vm239_vm12, %v1012_v54  ;;  %v1163_v47 = vsel %vm210_vm10, %v2229_v8, %v1157_v46 }
 0x581   :  { %v1685_v11 = vpop.f32.mrb[12].mxu0 }
 0x582   :  { %v1118_v12 = vadd.f32 %v1685_v11, %v1371_v7  ;;  %v1112_v13 = vpop.f32.mrb[13].mxu0 }
 0x583   :  { %v1113_v16 = vadd.f32 %v1371_v7, %v1112_v13 }
 0x584   :  { %v1132_v10 = vmax.f32 %v1118_v12, 0.0 }
 0x585   :  { %v1131_v18 = vmax.f32 %v1113_v16, 0.0  ;;  %v1688_v19 = vpop.f32.mrb[14].mxu0 }
 0x586   :  { %v1137_v21 = vsel %vm1136_vm15, %v1132_v10, -inf  ;;  %v1128_v22 = vadd.f32 %v1688_v19, %v1371_v7  ;;  %v1122_v9 = vpop.f32.mrb[15].mxu0 }
 0x587   :  { %v1135_v23 = vsel %vm210_vm10, %v1131_v18, -inf  ;;  %v1123_v24 = vadd.f32 %v1371_v7, %v1122_v9 }
 0x588   :  { %v1138_v25 = vmax.f32 %v1135_v23, %v1137_v21  ;;  %v1134_v20 = vmax.f32 %v1128_v22, 0.0 }
 0x589   :  { %v1133_v26 = vmax.f32 %v1123_v24, 0.0 }
 0x58a   :  { %v1139_v27 = vrot.slane %v1138_v25, 4  ;;  %v1146_v28 = vsel %vm1136_vm15, %v1134_v20, -inf }
 0x58b   :  { %v1145_v29 = vsel %vm210_vm10, %v1133_v26, -inf }
 0x58c   :  { %v1140_v30 = vmax.f32 %v1138_v25, %v1139_v27  ;;  %v1147_v31 = vmax.f32 %v1145_v29, %v1146_v28 }
 0x58e   :  { %v1141_v32 = vrot.slane %v1140_v30, 2  ;;  %v1148_v33 = vrot.slane %v1147_v31, 4 }
 0x590   :  { %v1142_v34 = vmax.f32 %v1140_v30, %v1141_v32  ;;  %v1149_v35 = vmax.f32 %v1147_v31, %v1148_v33 }
 0x592   :  { %v1150_v37 = vrot.slane %v1149_v35, 2  ;;  %v1143_v40 = vrot.slane %v1142_v34, 1 }
 0x594   :  { %v1151_v39 = vmax.f32 %v1149_v35, %v1150_v37  ;;  %v1144_v43 = vmax.f32 %v1142_v34, %v1143_v40 }
 0x596   :  { %v1152_v41 = vrot.slane %v1151_v39, 1 }
 0x598   :  { %v1153_v44 = vmax.f32 %v1151_v39, %v1152_v41 }
 0x59a   :  { %v1154_v45 = vsel %vm71_vm0, %v1144_v43, %v1153_v44 }
 0x59b   :  { %1160 = vrot.lane.b32.xlu1 %v1154_v45, %s1926_s1  ;;  %s1898_s1 = scalar_lea.vmem %s1265_s0, 32 }
 0x59c   :  { %p1899_p0 = scmp.ne.s32.totalorder %s1265_s0, %s1898_s1  ;;  %p1904_p2 = scmp.lt.s32.totalorder %s1898_s1, %s1898_s1 }
 0x59e   :  { %p1905_p3 = por %p1904_p2, %p1903_p1 }
 0x5a0   :  { %p1906_p4 = pnand %p1905_p3, %p1899_p0 }
 0x60d   :  { %v1161_v48 = vpop.permute.xlu1 %1160 }
 0x60e   :  { %v1164_v17 = vsel %vm215_vm11, %v1163_v47, %v1161_v48 }
 0x60f   :  { %1714 = vmatmul.mubr.msk.f32.vlgmr.msra.gmra.mrb[12].mxu1 %vm239_vm12, %v1164_v17 }
 0x6e2   :  { %v1253_v49 = vpop.f32.mrb[12].mxu1 }
 0x6e3   :  { %v1254_v50 = vadd.f32 %v1376_v15, %v1253_v49  ;;  %v1715_v51 = vpop.f32.mrb[13].mxu1 }
 0x6e5   :  { %1257 = vst.msk [vmem:[#allocation2] sm:$0x3] %vm1136_vm15, %v1254_v50 }
 0x6e6   :  { %1909 = shalt.err (!%p1906_p4)
}
 0x6e7   :  { %s1910_s21 = scalar_lea.hbm %s2472_s6, 32 }
 0x6e8   :  { %p1911_p5 = scmp.ne.s32.totalorder %s2472_s6, %s1910_s21  ;;  %p1914_p6 = scmp.lt.u32.totalorder %s1910_s21, %s2472_s6 }
 0x6ea   :  { %p1916_p7 = pnand %p1914_p6, %p1911_p5 }
 0x6ec   :  { %1919 = shalt.err (!%p1916_p7)
}
 0x6ed   :  { %1267 = dma.vmem_to_hbm [thread:$0]  %s1265_s0, 32, %s2472_s6, [#allocation3]  }
 0x6ee   :  { %1920 = dma.done.wait [#allocation3], 32  }
 0x6ef   :  { %1921 = vsyncadd [#allocation3], 4294967264 }
 0x6f0   :  { %1271 = vsyncpa [#allocation3], 1 }

</bundles_post_ra>
